<compile_context>
chip_gen: v6e
topology: v6e:2x2x1
jax: 0.10.0
libtpu: 0.0.40
codegen_flags: <defaults>
</compile_context>

<pallas_src>
import jax
import jax.numpy as jnp
from jax import lax
from jax.experimental import pallas as pl
from jax.experimental.pallas import tpu as pltpu


def _round_up(x, m):
    return -(-x // m) * m


def _make_kernel(pad, nb, c, h, w):
    w2p = w + 2 * pad
    h2p = h + 2 * pad
    # Lane-aligned width for the dynamic lane rotate (rotate an exact multiple
    # of the 128-lane vreg width; the extra lanes are replicate fill and are
    # cropped away after the roll).
    wp = _round_up(w2p, 128)

    def kernel(shift_ref, x_ref, out_ref, tall_ref):
        # shift_ref: SMEM (2*N,) int32 scalar prefetch; [2b] = width shift,
        #            [2b+1] = height shift, both in [0, 2*pad].
        # x_ref    : VMEM (nb, c, h, w)   input block
        # out_ref  : VMEM (nb, c, h, w)   output block
        # tall_ref : VMEM (c, h+2p, w)    width-resolved, height-padded scratch
        step = pl.program_id(0)

        def body(b, carry):
            gb = step * nb + b                     # global batch index
            sx = shift_ref[2 * gb]                 # horizontal (width) shift
            sy = shift_ref[2 * gb + 1]             # vertical (height) shift
            xb = x_ref[b]                          # (c, h, w)

            # ---- width: fused replicate pad (registers) + dynamic lane roll ----
            left = jnp.broadcast_to(xb[:, :, :1], (c, h, pad))
            right = jnp.broadcast_to(xb[:, :, w - 1:], (c, h, wp - w - pad))
            wide = jnp.concatenate([left, xb, right], axis=2)      # (c, h, wp)
            # Integer shift by sx == roll left by sx (jnp.roll semantics) then
            # crop the first w lanes:  rolled[..., j] = wide[..., j + sx].
            rolled = pltpu.roll(wide, (wp - sx) % wp, 2)
            wshift = rolled[:, :, :w]                               # (c, h, w)

            # ---- height: fused replicate pad + dynamic sublane slice ----
            top = jnp.broadcast_to(wshift[:, :1, :], (c, pad, w))
            bot = jnp.broadcast_to(wshift[:, h - 1:, :], (c, pad, w))
            tall_ref[...] = jnp.concatenate([top, wshift, bot], axis=1)
            out_ref[b] = tall_ref[:, pl.ds(sy, h), :].astype(out_ref.dtype)
            return carry

        lax.fori_loop(0, nb, body, 0)

    return kernel


def random_shifts_aug(x, shift, pad, *, block_n=16, vmem_limit_bytes=None,
                      donate_input=False):
    """RandomShiftsAug forward.

    x:     (N, C, H, W)
    shift: (N, 2) integer shifts in [0, 2*pad]; [:, 0] = x/width, [:, 1] = y/height
    """
    n, c, h, w = x.shape
    assert h == w                          # matches the PyTorch module's assert
    assert pad >= 1

    # Guard against out-of-range shifts (stale-scratch garbage otherwise).
    shift = jnp.clip(shift.astype(jnp.int32), 0, 2 * pad)

    # Batch elements per grid step: big enough to amortize the ~0.35us step
    # overhead, but always >= 2 grid steps when N >= 2 so both v7x TensorCores
    # are used ("parallel" axis).
    nb = max(1, min(block_n, -(-n // 2)))
    n_pad = _round_up(n, nb)
    if n_pad != n:                         # cdiv grid: pad the batch tail
        x_in = jnp.pad(x, ((0, n_pad - n), (0, 0), (0, 0), (0, 0)))
        s_in = jnp.pad(shift, ((0, n_pad - n), (0, 0)))
    else:
        x_in, s_in = x, shift
    # Flat 1-D int32 scalar-prefetch layout (a (N,2) SMEM array would pad to
    # (ceil(N/8)*8, 128) words).
    shift_flat = s_in.reshape(-1)

    if vmem_limit_bytes is None:
        vmem_limit_bytes = 48 * 1024 * 1024   # > v5e's 16MiB default, < v7x's 64MiB

    grid_spec = pltpu.PrefetchScalarGridSpec(
        num_scalar_prefetch=1,
        grid=(n_pad // nb,),
        in_specs=[pl.BlockSpec((nb, c, h, w), lambda i, s: (i, 0, 0, 0))],
        out_specs=pl.BlockSpec((nb, c, h, w), lambda i, s: (i, 0, 0, 0)),
        scratch_shapes=[pltpu.VMEM((c, h + 2 * pad, w), x.dtype)],
    )
    out = pl.pallas_call(
        _make_kernel(pad, nb, c, h, w),
        out_shape=jax.ShapeDtypeStruct((n_pad, c, h, w), x.dtype),
        grid_spec=grid_spec,
        compiler_params=pltpu.CompilerParams(
            dimension_semantics=("parallel",),
            vmem_limit_bytes=vmem_limit_bytes,
        ),
        # Safe to alias: each output block depends only on its own input block.
        input_output_aliases=({1: 0} if donate_input else {}),
    )(shift_flat, x_in)
    return out if n_pad == n else out[:n]


def _reference(x, shift, pad):
    # Integer shifts -> exact shifted crop of the replicate-padded image.
    n, c, h, w = x.shape
    x_pad = jnp.pad(x, ((0, 0), (0, 0), (pad, pad), (pad, pad)), mode="edge")
    return jnp.stack([
        lax.dynamic_slice(x_pad[b], (0, int(shift[b, 1]), int(shift[b, 0])),
                          (c, h, w))
        for b in range(n)
    ])


if __name__ == "__main__":
    pad = 4                                  # DrQ-v2 default
    key = jax.random.PRNGKey(0)
    kx, ks, kx2, ks2 = jax.random.split(key, 4)

    # Small demo shape.
    n, c, h, w = 2, 4, 16, 16
    x = jax.random.normal(kx, (n, c, h, w), dtype=jnp.float32)
    # TODO(synk): torch.randint's RNG stream cannot be reproduced bit-for-bit;
    # shifts are drawn with jax.random and fed to the kernel via scalar prefetch.
    shift = jax.random.randint(ks, (n, 2), 0, 2 * pad + 1, dtype=jnp.int32)
    out = jax.block_until_ready(random_shifts_aug(x, shift, pad))
    assert out.shape == (n, c, h, w)
    assert bool(jnp.all(out == _reference(x, shift, pad)))

    # Production DrQ-v2 shape (9 stacked-frame channels, 84x84): exercises the
    # non-(8,128)-aligned sublane/lane paths flagged by the review.
    n2, c2, h2, w2 = 2, 9, 84, 84
    x2 = jax.random.normal(kx2, (n2, c2, h2, w2), dtype=jnp.float32)
    shift2 = jax.random.randint(ks2, (n2, 2), 0, 2 * pad + 1, dtype=jnp.int32)
    out2 = jax.block_until_ready(random_shifts_aug(x2, shift2, pad))
    assert out2.shape == (n2, c2, h2, w2)
    assert bool(jnp.all(out2 == _reference(x2, shift2, pad)))

    print("KERNEL_OK")
</pallas_src>

<mosaic_0001>
module attributes {stable_mosaic.version = 11 : i64} {
  func.func @kernel(%arg0: i32, %arg1: memref<4xi32, #tpu.memory_space<smem>>, %arg2: memref<1x4x16x16xf32, #tpu.memory_space<vmem>>, %arg3: memref<1x4x16x16xf32, #tpu.memory_space<vmem>>, %arg4: memref<4x24x16xf32, #tpu.memory_space<vmem>>) attributes {dimension_semantics = [#tpu.dimension_semantics<parallel>], iteration_bounds = array<i64: 2>, scalar_prefetch = 1 : i64, scratch_operands = 1 : i64, tpu.core_type = #tpu.core_type<tc>, window_params = [{transform_indices = @transform_0, window_bounds = array<i64: 1, 4, 16, 16>}, {transform_indices = @transform_1, window_bounds = array<i64: 1, 4, 16, 16>}]} {
    %c0_i32 = arith.constant 0 : i32
    %c1_i32 = arith.constant 1 : i32
    %0 = arith.muli %arg0, %c1_i32 : i32
    %1 = arith.addi %0, %c0_i32 : i32
    %c2_i32 = arith.constant 2 : i32
    %2 = arith.muli %c2_i32, %1 : i32
    %3 = arith.index_cast %2 : i32 to index
    %4 = memref.load %arg1[%3] : memref<4xi32, #tpu.memory_space<smem>>
    %c2_i32_0 = arith.constant 2 : i32
    %5 = arith.muli %c2_i32_0, %1 : i32
    %c1_i32_1 = arith.constant 1 : i32
    %6 = arith.addi %5, %c1_i32_1 : i32
    %7 = arith.index_cast %6 : i32 to index
    %8 = memref.load %arg1[%7] : memref<4xi32, #tpu.memory_space<smem>>
    %9 = arith.index_cast %c0_i32 : i32 to index
    %c0 = arith.constant 0 : index
    %c0_2 = arith.constant 0 : index
    %c0_3 = arith.constant 0 : index
    %10 = vector.load %arg2[%9, %c0, %c0_2, %c0_3] : memref<1x4x16x16xf32, #tpu.memory_space<vmem>>, vector<1x4x16x16xf32>
    %11 = vector.shape_cast %10 : vector<1x4x16x16xf32> to vector<4x16x16xf32>
    %12 = vector.extract_strided_slice %11 {offsets = [0, 0, 0], sizes = [4, 16, 1], strides = [1, 1, 1]} : vector<4x16x16xf32> to vector<4x16x1xf32>
    %13 = vector.shape_cast %12 : vector<4x16x1xf32> to vector<4x16x1xf32>
    %14 = vector.broadcast %13 : vector<4x16x1xf32> to vector<4x16x4xf32>
    %15 = vector.extract_strided_slice %11 {offsets = [0, 0, 15], sizes = [4, 16, 1], strides = [1, 1, 1]} : vector<4x16x16xf32> to vector<4x16x1xf32>
    %16 = vector.shape_cast %15 : vector<4x16x1xf32> to vector<4x16x1xf32>
    %17 = vector.broadcast %16 : vector<4x16x1xf32> to vector<4x16x108xf32>
    %18 = tpu.concatenate %14, %11, %17 in 2 : vector<4x16x4xf32>, vector<4x16x16xf32>, vector<4x16x108xf32> -> vector<4x16x128xf32>
    %c128_i32 = arith.constant 128 : i32
    %19 = arith.subi %c128_i32, %4 : i32
    %c128_i32_4 = arith.constant 128 : i32
    %c0_i32_5 = arith.constant 0 : i32
    %20 = arith.cmpi eq, %c128_i32_4, %c0_i32_5 : i32
    %c1_i32_6 = arith.constant 1 : i32
    %21 = arith.select %20, %c1_i32_6, %c128_i32_4 : i32
    %22 = arith.remsi %19, %21 : i32
    %c0_i32_7 = arith.constant 0 : i32
    %23 = arith.cmpi ne, %22, %c0_i32_7 : i32
    %c0_i32_8 = arith.constant 0 : i32
    %24 = arith.cmpi slt, %22, %c0_i32_8 : i32
    %c0_i32_9 = arith.constant 0 : i32
    %25 = arith.cmpi slt, %21, %c0_i32_9 : i32
    %26 = arith.xori %24, %25 : i1
    %27 = arith.andi %26, %23 : i1
    %28 = arith.addi %22, %21 : i32
    %29 = arith.select %27, %28, %22 : i32
    %30 = tpu.dynamic_rotate %18 by %29 dim 2 : vector<4x16x128xf32>, i32 -> vector<4x16x128xf32>
    %31 = vector.extract_strided_slice %30 {offsets = [0, 0, 0], sizes = [4, 16, 16], strides = [1, 1, 1]} : vector<4x16x128xf32> to vector<4x16x16xf32>
    %32 = vector.extract_strided_slice %31 {offsets = [0, 0, 0], sizes = [4, 1, 16], strides = [1, 1, 1]} : vector<4x16x16xf32> to vector<4x1x16xf32>
    %33 = vector.shape_cast %32 : vector<4x1x16xf32> to vector<4x1x16xf32>
    %34 = vector.broadcast %33 : vector<4x1x16xf32> to vector<4x4x16xf32>
    %35 = vector.extract_strided_slice %31 {offsets = [0, 15, 0], sizes = [4, 1, 16], strides = [1, 1, 1]} : vector<4x16x16xf32> to vector<4x1x16xf32>
    %36 = vector.shape_cast %35 : vector<4x1x16xf32> to vector<4x1x16xf32>
    %37 = vector.broadcast %36 : vector<4x1x16xf32> to vector<4x4x16xf32>
    %38 = tpu.concatenate %34, %31, %37 in 1 : vector<4x4x16xf32>, vector<4x16x16xf32>, vector<4x4x16xf32> -> vector<4x24x16xf32>
    %c0_10 = arith.constant 0 : index
    %c0_11 = arith.constant 0 : index
    %c0_12 = arith.constant 0 : index
    %39 = vector.load %arg4[%c0_10, %c0_11, %c0_12] : memref<4x24x16xf32, #tpu.memory_space<vmem>>, vector<4x24x16xf32>
    tpu.vector_store %arg4[%c0_10, %c0_11, %c0_12], %38 {strides = array<i32>} : memref<4x24x16xf32, #tpu.memory_space<vmem>>, vector<4x24x16xf32>,
    %c0_13 = arith.constant 0 : index
    %40 = arith.index_cast %8 : i32 to index
    %c0_14 = arith.constant 0 : index
    %41 = vector.load %arg4[%c0_13, %40, %c0_14] : memref<4x24x16xf32, #tpu.memory_space<vmem>>, vector<4x16x16xf32>
    %42 = arith.index_cast %c0_i32 : i32 to index
    %c0_15 = arith.constant 0 : index
    %c0_16 = arith.constant 0 : index
    %c0_17 = arith.constant 0 : index
    %43 = vector.load %arg3[%42, %c0_15, %c0_16, %c0_17] : memref<1x4x16x16xf32, #tpu.memory_space<vmem>>, vector<1x4x16x16xf32>
    %44 = vector.shape_cast %43 : vector<1x4x16x16xf32> to vector<4x16x16xf32>
    %45 = vector.shape_cast %41 : vector<4x16x16xf32> to vector<1x4x16x16xf32>
    tpu.vector_store %arg3[%42, %c0_15, %c0_16, %c0_17], %45 {strides = array<i32>} : memref<1x4x16x16xf32, #tpu.memory_space<vmem>>, vector<1x4x16x16xf32>,
    %c1_i32_18 = arith.constant 1 : i32
    return
  }
  func.func @transform_0(%arg0: i32, %arg1: memref<4xi32, #tpu.memory_space<smem>>) -> (i32, i32, i32, i32) {
    %c0_i32 = arith.constant 0 : i32
    %c0_i32_0 = arith.constant 0 : i32
    %c0_i32_1 = arith.constant 0 : i32
    %c0_i32_2 = arith.constant 0 : i32
    return %arg0, %c0_i32, %c0_i32_0, %c0_i32_1 : i32, i32, i32, i32
  }
  func.func @transform_1(%arg0: i32, %arg1: memref<4xi32, #tpu.memory_space<smem>>) -> (i32, i32, i32, i32) {
    %c0_i32 = arith.constant 0 : i32
    %c0_i32_0 = arith.constant 0 : i32
    %c0_i32_1 = arith.constant 0 : i32
    %c0_i32_2 = arith.constant 0 : i32
    return %arg0, %c0_i32, %c0_i32_0, %c0_i32_1 : i32, i32, i32, i32
  }
}

</mosaic_0001>

<bundles_post_ra>
// kernel: tpu_custom_call.1
= control target key start
LH: loop header
LB: loop body
LE: loop exit
PB: predicated region body
PF: predicated region fallthrough
CT: control target
= control target key end

     0   :  { %s670_s9 = smov [#allocation4]   ;;  %s909_s0 = inlined_call_operand.hbm [shape: s32[4], index: 0, kind: input, shape index: {}]   ;;  %s910_s1 = inlined_call_operand.hbm [shape: f32[2,4,16,16], index: 1, kind: input, shape index: {}]   ;;  %s911_s2 = inlined_call_operand.hbm [shape: f32[2,4,16,16], index: 2, kind: output, shape index: {}]  }
   0x1   :  { %8 = dma.hbm_to_smem %s909_s0, 16, %s670_s9, [#allocation3] }
   0x2   :  { %644 = dma.done.wait [#allocation3], 16 }
   0x3   :  { %645 = vsyncadd [#allocation3], 4294967280 }
   0x4   :  { %10 = sfence }
   0x5   :  { %11 = vsyncpa [#allocation6], 0 }
   0x6   :  { %13 = vsyncpa [#allocation6 + $0x1], 0 }
   0x7   :  { %14 = vsyncpa [#allocation7], 0 }
   0x8   :  { %16 = vsyncpa [#allocation7 + $0x1], 0  ;;  %s698_s12 = smov 0   ;;  %s700_s13 = smov 0  }
   0x9   :  { %s702_s14 = smov 0   ;;  %s704_s15 = smov 0  }
   0xa LB: > { %s719_s0 = sadd.s32 4294967295, %s668_s15   ;;  %s488_s16 = sadd.s32 4294967294, %s668_s15   ;;  %s668_s15 = sphi %s704_s15, %s926_s15   ;;  %s664_s14 = sphi %s702_s14, %s925_s14   ;;  %s660_s13 = sphi %s700_s13, %s924_s13   ;;  %s656_s12 = sphi %s698_s12, %s923_s12  }
   0xb   : > { %s723_s17 = sadd.s32 1, %s668_s15   ;;  %s29_s18 = sadd.s32 1, %s664_s14 }
   0xc   : > { %s26_s19 = ssub.s32 %s668_s15, %s723_s17  ;;  %p36_p0 = scmp.ne.s32.totalorder %s664_s14, %s660_s13 }
   0xd   : > { %p27_p1 = scmp.eq.s32.totalorder %s26_s19, 0  ;;  %p37_p2 = scmp.eq.s32.totalorder %s668_s15, 0 }
   0xe   : > { %p42_p3 = scmp.ne.s32.totalorder %s660_s13, %s656_s12  ;;  %p43_p4 = scmp.eq.s32.totalorder %s719_s0, 0 }
   0xf   : > { %s735_s20 = scalar_select %p27_p1, %s664_s14, %s29_s18  }
  0x10   : > { %p737_p5 = por %p37_p2, %p36_p0  ;;  %p741_p6 = por %p43_p4, %p42_p3 }
  0x11   : > { %p66_p7 = scmp.eq.s32.totalorder %s719_s0, 1  ;;  %p72_p8 = scmp.eq.s32.totalorder %s488_s16, 1 }
  0x12   : > { %s915_s22 = scalar_select %p741_p6, 1, 0 }
  0x13   : > { %p520_p10 = scmp.lt.s32.totalorder %s668_s15, 2  ;;  %p748_p11 = por %p66_p7, %p36_p0 }
  0x14   : > { %p752_p12 = por %p72_p8, %p42_p3  ;;  %s92_s25 = sand.u32 1, %s664_s14  }
  0x15   : > { %s916_s23 = scalar_select %p748_p11, 1, 0 }
  0x16   : > { %s917_s24 = scalar_select %p752_p12, 1, 0 }
  0x17   : > { %s506_s26 = sshll.u32 %s668_s15, 10  ;;  %s491_s27 = sshll.u32 %s92_s25, 6 }
  0x18   : > { %s761_s30 = scalar_lea.hbm %s910_s1, %s506_s26  ;;  %s96_s3 = scalar_lea.vmem [#allocation5], %s491_s27 }
  0x19   : > { %s103_s4 = sshll.u32 %s96_s3, 4  ;;  %p765_p13 = pnand %p520_p10, %p737_p5  ;;  %s769_s4 = int_to_ptr.vmem [resolvable:$true] %s103_s4 }
  0x1a   : > { %s771_s6 = scalar_lea.sflag [#allocation6], %s92_s25  ;;  %s574_s7 = scalar_lea.hbm %s761_s30, 1024 }
  0x1b   : > { %p575_p0 = scmp.ne.s32.totalorder %s761_s30, %s574_s7  ;;  %p576_p1 = pneg %p765_p13 }
  0x1c   : > { %s579_s10 = scalar_lea.hbm %s910_s1, 2048  ;;  %p580_p4 = scmp.lt.s32.totalorder %s761_s30, %s910_s1 }
  0x1d   : > { %p577_p2 = pnand %p576_p1, %p575_p0  ;;  %p581_p5 = scmp.lt.s32.totalorder %s579_s10, %s574_s7 }
  0x1f   : > { %p578_p3 = pneg %p577_p2  ;;  %p582_p7 = por %p581_p5, %p580_p4 }
  0x21   : > { %p583_p8 = pnand %p582_p7, %p578_p3 }
  0x23   : > { %586 = shalt.err (!%p583_p8)
}
  0x24   : > { %s587_s18 = scalar_lea.vmem %s769_s4, 1024  ;;  %s671_s19 = smov [#allocation5]  }
  0x25   : > { %p588_p10 = scmp.ne.s32.totalorder %s769_s4, %s587_s18  ;;  %s592_s21 = sshll.u32 %s671_s19, 4  ;;  %s593_s21 = int_to_ptr.vmem [resolvable:$false] %s592_s21 }
  0x26   : > { %s594_s25 = scalar_lea.vmem %s593_s21, 2048  ;;  %p595_p2 = scmp.lt.s32.totalorder %s769_s4, %s593_s21 }
  0x27   : > { %p590_p9 = pnand %p588_p10, %p576_p1  ;;  %p596_p12 = scmp.lt.s32.totalorder %s594_s25, %s587_s18 }
  0x29   : > { %p591_p0 = pneg %p590_p9  ;;  %p597_p11 = por %p596_p12, %p595_p2 }
  0x2b   : > { %p598_p6 = pnand %p597_p11, %p591_p0 }
  0x2d   : > { %601 = shalt.err (!%p598_p6)
}
  0x2e   : > { %s672_s26 = smov 128   ;;  %s673_s27 = smov 8  }
  0x2f   : > { %515 = dma.hbm_to_vmem [thread:$0]  (!%p765_p13), %s761_s30, 1024, %s769_s4, %s771_s6, %s672_s26, %s672_s26, %s673_s27  }
  0x30   : > { %p494_p9 = scmp.ge.s32.totalorder %s668_s15, 1  ;;  %p111_p1 = scmp.lt.s32.totalorder %s668_s15, 3 }
  0x32   : > { %p112_p3 = pnand %p494_p9, %p111_p1 }
  0x33   : > { %s795_s28 = sand.u32 (!%p112_p3), 1, %s660_s13   ;;  %p919_p6 = scmp.ne.s32.totalorder (!%p112_p3), %s915_s22, 0 }
  0x34   : > { %115 = sbr.rel (%p112_p3) target bundleno = 376 (0x178), region = 24  ;;  %s495_s29 = sshll.u32 (!%p112_p3), %s795_s28, 6 }
  0x35   : > { %s118_s3 = scalar_lea.sflag (!%p112_p3), [#allocation6], %s795_s28  ;;  %s121_s7 = scalar_lea.vmem (!%p112_p3), [#allocation5], %s495_s29 }
  0x39   : > { %647 = dma.done.wait (%p919_p6), %s118_s3, 1024  }
  0x3a   : > { %649 = vsyncadd (%p919_p6), %s118_s3, 4294966272  ;;  %v674_v0 = vmov 0   ;;  %v146_v1 = vld [vmem:[%s121_s7 + $0x10] sm:$0xff]  ;;  %v144_v2 = vld [vmem:[%s121_s7] sm:$0xff]  ;;  %v675_v9 = vmov 15   ;;  %s676_s22 = smov 4   ;;  %v297_v50 = vlaneseq }
  0x3b   : > { %563 = vset.pattern.permute.xlu1 %v674_v0  ;;  %562 = vset.pattern.permute.xlu0 %v674_v0  ;;  %v147_v3 = vld [vmem:[%s121_s7 + $0x18] sm:$0xff]  ;;  %v145_v4 = vld [vmem:[%s121_s7 + $0x8] sm:$0xff]  ;;  %v148_v6 = vld [vmem:[%s121_s7 + $0x20] sm:$0xff]  ;;  %s497_s30 = sshll.u32 %s719_s0, 1  ;;  %vm248_vm0 = vcmask 31744   ;;  %vm257_vm1 = vcmask 162816  }
  0x3c   : > { %164 = vperm.xlu1 %563, %v146_v1   ;;  %154 = vperm.xlu0 %562, %v144_v2   ;;  %v149_v5 = vld [vmem:[%s121_s7 + $0x28] sm:$0xff]  ;;  %v151_v7 = vld [vmem:[%s121_s7 + $0x38] sm:$0xff]  ;;  %v150_v8 = vld [vmem:[%s121_s7 + $0x30] sm:$0xff]  ;;  %s141_s4 = sld [smem:[#allocation4 + %s497_s30]]  ;;  %v298_v51 = vshrl.u32 %v297_v50, 7  ;;  %vm337_vm2 = vcmask 1043456  }
  0x3d   : > { %vm370_vm3 = vcmask 130048   ;;  %s142_s18 = sadd.s32 1, %s497_s30  ;;  %s507_s21 = sshll.u32 %s719_s0, 10 }
  0x3e   : > { %v315_v52 = vsub.s32 7, %v298_v51  ;;  %v299_v53 = vsub.s32 0, %v298_v51  ;;  %s143_s19 = sld [smem:[#allocation4 + %s142_s18]]  ;;  %s139_s25 = scalar_lea.vmem [#allocation8], %s495_s29 }
  0x3f   : > { %s414_s26 = sshll.u32 %s139_s25, 4  ;;  %s401_s0 = scalar_lea.sflag [#allocation7], %s795_s28  ;;  %s858_s26 = int_to_ptr.vmem [resolvable:$true] %s414_s26 }
  0x40   : > { %169 = vperm.xlu1 %563, %v147_v3   ;;  %159 = vperm.xlu0 %562, %v145_v4   ;;  %s602_s29 = scalar_lea.vmem %s858_s26, 1024  ;;  %p920_p4 = scmp.ne.s32.totalorder %s916_s23, 0 }
  0x41   : > { %p603_p13 = scmp.ne.s32.totalorder %s858_s26, %s602_s29  ;;  %s677_s30 = smov [#allocation8]  }
  0x42   : > { %s266_s5 = ssub.s32 128, %s141_s4  ;;  %s606_s4 = sshll.u32 %s677_s30, 4  ;;  %s607_s4 = int_to_ptr.vmem [resolvable:$false] %s606_s4 }
  0x43   : > { %s268_s6 = ssub.s32 0, %s266_s5  ;;  %p267_p11 = scmp.lt.s32.totalorder %s266_s5, 0 }
  0x44   : > { %179 = vperm.xlu1 %563, %v149_v5   ;;  %174 = vperm.xlu0 %562, %v148_v6   ;;  %s498_s8 = smin.u32 %s268_s6, %s266_s5  ;;  %s383_s27 = scalar_lea.vmem [#allocation2], %s143_s19 }
  0x45   : > { %s270_s9 = sand.u32 127, %s498_s8   ;;  %p604_p5 = pnand %p603_p13, %p920_p4 }
  0x46   : > { %s271_s10 = ssub.s32 0, %s270_s9  ;;  %s608_s5 = scalar_lea.vmem %s607_s4, 2048 }
  0x47   : > { %s928_s10 = smov (!%p267_p11, %s271_s10), %s270_s9  ;;  %p605_p7 = pneg %p604_p5 }
  0x48   : > { %189 = vperm.xlu1 %563, %v151_v7   ;;  %184 = vperm.xlu0 %562, %v150_v8   ;;  %p500_p12 = scmp.lt.s32.totalorder %s928_s10, 0  ;;  %s277_s11 = sadd.s32 128, %s928_s10 }
  0x49   : > { %p609_p8 = scmp.lt.s32.totalorder %s858_s26, %s607_s4  ;;  %p610_p10 = scmp.lt.s32.totalorder %s608_s5, %s602_s29 }
  0x4a   : > { %s930_s11 = smov (!%p500_p12, %s277_s11), %s928_s10 }
  0x4b   : > { %s279_s16 = sand.u32 127, %s930_s11   ;;  %p611_p0 = por %p610_p10, %p609_p8 }
  0x4c   : > { %565 = vset.pattern.permute.xlu1 %v675_v9  ;;  %564 = vset.pattern.permute.xlu0 %v675_v9 }
  0x4d   : > { %197 = vperm.xlu1 %565, %v145_v4   ;;  %193 = vperm.xlu0 %564, %v144_v2   ;;  %p612_p2 = pnand %p611_p0, %p605_p7 }
  0x51   : > { %201 = vperm.xlu1 %565, %v146_v1   ;;  %205 = vperm.xlu0 %564, %v147_v3  }
  0x55   : > { %209 = vperm.xlu1 %565, %v148_v6   ;;  %213 = vperm.xlu0 %564, %v149_v5  }
  0x59   : > { %217 = vperm.xlu1 %565, %v150_v8   ;;  %221 = vperm.xlu0 %564, %v151_v7  }
  0x5d   : > { %224 = vrot.lane.b32.xlu1 %v144_v2, %s676_s22  ;;  %226 = vrot.lane.b32.xlu0 %v145_v4, %s676_s22 }
  0x61   : > { %228 = vrot.lane.b32.xlu1 %v146_v1, %s676_s22  ;;  %230 = vrot.lane.b32.xlu0 %v147_v3, %s676_s22 }
  0x65   : > { %232 = vrot.lane.b32.xlu1 %v148_v6, %s676_s22  ;;  %234 = vrot.lane.b32.xlu0 %v149_v5, %s676_s22 }
  0x69   : > { %236 = vrot.lane.b32.xlu1 %v150_v8, %s676_s22  ;;  %238 = vrot.lane.b32.xlu0 %v151_v7, %s676_s22  ;;  %s856_s22 = scalar_lea.hbm %s911_s2, %s507_s21 }
  0xb7   : > { %v165_v10 = vpop.permute.xlu1 %164  ;;  %v155_v11 = vpop.permute.xlu0 %154 }
  0xbb   : > { %v170_v12 = vpop.permute.xlu1 %169  ;;  %v160_v13 = vpop.permute.xlu0 %159 }
  0xbf   : > { %v180_v14 = vpop.permute.xlu1 %179  ;;  %v175_v15 = vpop.permute.xlu0 %174 }
  0xc3   : > { %v190_v16 = vpop.permute.xlu1 %189  ;;  %v185_v17 = vpop.permute.xlu0 %184 }
  0xc8   : > { %v198_v18 = vpop.permute.xlu1 %197  ;;  %v194_v19 = vpop.permute.xlu0 %193 }
  0xcc   : > { %v202_v20 = vpop.permute.xlu1 %201  ;;  %v206_v21 = vpop.permute.xlu0 %205 }
  0xd0   : > { %v210_v22 = vpop.permute.xlu1 %209  ;;  %v214_v23 = vpop.permute.xlu0 %213 }
  0xd4   : > { %v218_v24 = vpop.permute.xlu1 %217  ;;  %v222_v25 = vpop.permute.xlu0 %221 }
  0xd8   : > { %v225_v26 = vpop.permute.xlu1 %224  ;;  %v227_v27 = vpop.permute.xlu0 %226 }
  0xd9   : > { %v249_v28 = vsel %vm248_vm0, %v155_v11, %v225_v26  ;;  %v250_v29 = vsel %vm248_vm0, %v160_v13, %v227_v27 }
  0xda   : > { %v259_v30 = vsel %vm257_vm1, %v250_v29, %v198_v18  ;;  %v258_v31 = vsel %vm257_vm1, %v249_v28, %v194_v19 }
  0xdb   : > { %283 = vrot.lane.b32.xlu0 %v259_v30, %s279_s16  ;;  %281 = vrot.lane.b32.xlu1 %v258_v31, %s279_s16 }
  0xdc   : > { %v229_v32 = vpop.permute.xlu1 %228  ;;  %v231_v33 = vpop.permute.xlu0 %230 }
  0xdd   : > { %v251_v34 = vsel %vm248_vm0, %v165_v10, %v229_v32  ;;  %v252_v35 = vsel %vm248_vm0, %v170_v12, %v231_v33 }
  0xde   : > { %v261_v36 = vsel %vm257_vm1, %v252_v35, %v206_v21  ;;  %v260_v37 = vsel %vm257_vm1, %v251_v34, %v202_v20 }
  0xdf   : > { %287 = vrot.lane.b32.xlu0 %v261_v36, %s279_s16  ;;  %285 = vrot.lane.b32.xlu1 %v260_v37, %s279_s16 }
  0xe0   : > { %v233_v38 = vpop.permute.xlu1 %232  ;;  %v235_v39 = vpop.permute.xlu0 %234 }
  0xe1   : > { %v253_v40 = vsel %vm248_vm0, %v175_v15, %v233_v38  ;;  %v254_v41 = vsel %vm248_vm0, %v180_v14, %v235_v39 }
  0xe2   : > { %v263_v42 = vsel %vm257_vm1, %v254_v41, %v214_v23  ;;  %v262_v43 = vsel %vm257_vm1, %v253_v40, %v210_v22 }
  0xe3   : > { %291 = vrot.lane.b32.xlu0 %v263_v42, %s279_s16  ;;  %289 = vrot.lane.b32.xlu1 %v262_v43, %s279_s16 }
  0xe4   : > { %v237_v44 = vpop.permute.xlu1 %236  ;;  %v239_v45 = vpop.permute.xlu0 %238 }
  0xe5   : > { %v255_v46 = vsel %vm248_vm0, %v185_v17, %v237_v44  ;;  %v256_v47 = vsel %vm248_vm0, %v190_v16, %v239_v45 }
  0xe6   : > { %v265_v48 = vsel %vm257_vm1, %v256_v47, %v222_v25  ;;  %v264_v49 = vsel %vm257_vm1, %v255_v46, %v218_v24 }
  0xe7   : > { %295 = vrot.lane.b32.xlu0 %v265_v48, %s279_s16  ;;  %293 = vrot.lane.b32.xlu1 %v264_v49, %s279_s16 }
 0x14d   : > { %v284_v54 = vpop.permute.xlu0 %283  ;;  %v282_v55 = vpop.permute.xlu1 %281 }
 0x14e   : > { %v316_v56 = vrot.slane %v284_v54, %v315_v52  ;;  %v339_v57 = vrot.slane %v284_v54, 4  ;;  %v300_v58 = vrot.slane %v282_v55, %v299_v53  ;;  %v338_v59 = vrot.slane %v282_v55, 4 }
 0x150   : > { %v366_v60 = vsel %vm337_vm2, %v339_v57, %v316_v56  ;;  %v340_v61 = vsel %vm337_vm2, %v338_v59, %v339_v57  ;;  %v362_v62 = vsel %vm337_vm2, %v300_v58, %v338_v59 }
 0x151   : > { %373 = vst.msk [vmem:[#allocation2 + $0x10] sm:$0xff] %vm370_vm3, %v366_v60  ;;  %371 = vst.msk [vmem:[#allocation2] sm:$0xff] %vm370_vm3, %v362_v62  ;;  %v288_v63 = vpop.permute.xlu0 %287  ;;  %v286_v0 = vpop.permute.xlu1 %285 }
 0x152   : > { %372 = vst.msk [vmem:[#allocation2 + $0x8] sm:$0xff] %vm370_vm3, %v340_v61  ;;  %v320_v1 = vrot.slane %v288_v63, %v315_v52  ;;  %v342_v2 = vrot.slane %v288_v63, 4  ;;  %v304_v3 = vrot.slane %v286_v0, %v299_v53  ;;  %v341_v4 = vrot.slane %v286_v0, 4 }
 0x154   : > { %v367_v5 = vsel %vm337_vm2, %v342_v2, %v320_v1  ;;  %v343_v6 = vsel %vm337_vm2, %v341_v4, %v342_v2  ;;  %v363_v7 = vsel %vm337_vm2, %v304_v3, %v341_v4 }
 0x155   : > { %376 = vst.msk [vmem:[#allocation2 + $0x28] sm:$0xff] %vm370_vm3, %v367_v5  ;;  %374 = vst.msk [vmem:[#allocation2 + $0x18] sm:$0xff] %vm370_vm3, %v363_v7  ;;  %v292_v8 = vpop.permute.xlu0 %291  ;;  %v290_v9 = vpop.permute.xlu1 %289 }
 0x156   : > { %375 = vst.msk [vmem:[#allocation2 + $0x20] sm:$0xff] %vm370_vm3, %v343_v6  ;;  %v324_v10 = vrot.slane %v292_v8, %v315_v52  ;;  %v345_v11 = vrot.slane %v292_v8, 4  ;;  %v308_v12 = vrot.slane %v290_v9, %v299_v53  ;;  %v344_v13 = vrot.slane %v290_v9, 4 }
 0x158   : > { %v368_v14 = vsel %vm337_vm2, %v345_v11, %v324_v10  ;;  %v346_v15 = vsel %vm337_vm2, %v344_v13, %v345_v11  ;;  %v364_v16 = vsel %vm337_vm2, %v308_v12, %v344_v13 }
 0x159   : > { %379 = vst.msk [vmem:[#allocation2 + $0x40] sm:$0xff] %vm370_vm3, %v368_v14  ;;  %377 = vst.msk [vmem:[#allocation2 + $0x30] sm:$0xff] %vm370_vm3, %v364_v16  ;;  %v296_v17 = vpop.permute.xlu0 %295  ;;  %v294_v18 = vpop.permute.xlu1 %293 }
 0x15a   : > { %378 = vst.msk [vmem:[#allocation2 + $0x38] sm:$0xff] %vm370_vm3, %v346_v15  ;;  %v328_v19 = vrot.slane %v296_v17, %v315_v52  ;;  %v348_v20 = vrot.slane %v296_v17, 4  ;;  %v312_v21 = vrot.slane %v294_v18, %v299_v53  ;;  %v347_v22 = vrot.slane %v294_v18, 4 }
 0x15c   : > { %v369_v23 = vsel %vm337_vm2, %v348_v20, %v328_v19  ;;  %v349_v24 = vsel %vm337_vm2, %v347_v22, %v348_v20  ;;  %v365_v25 = vsel %vm337_vm2, %v312_v21, %v347_v22 }
 0x15d   : > { %382 = vst.msk [vmem:[#allocation2 + $0x58] sm:$0xff] %vm370_vm3, %v369_v23  ;;  %380 = vst.msk [vmem:[#allocation2 + $0x48] sm:$0xff] %vm370_vm3, %v365_v25 }
 0x15e   : > { %381 = vst.msk [vmem:[#allocation2 + $0x50] sm:$0xff] %vm370_vm3, %v349_v24 }
 0x165   : > { %v384_v26 = vld [vmem:[%s383_s27] sm:$0xff]  ;;  %v385_v27 = vld [vmem:[%s383_s27 + $0x8] sm:$0xff]  ;;  %v386_v28 = vld [vmem:[%s383_s27 + $0x18] sm:$0xff] }
 0x166   : > { %v387_v29 = vld [vmem:[%s383_s27 + $0x20] sm:$0xff]  ;;  %v388_v30 = vld [vmem:[%s383_s27 + $0x30] sm:$0xff]  ;;  %v389_v31 = vld [vmem:[%s383_s27 + $0x38] sm:$0xff]  ;;  %392 = vst.msk [vmem:[%s139_s25] sm:$0xff] %vm370_vm3, %v384_v26 }
 0x167   : > { %393 = vst.msk [vmem:[%s139_s25 + $0x8] sm:$0xff] %vm370_vm3, %v385_v27  ;;  %394 = vst.msk [vmem:[%s139_s25 + $0x10] sm:$0xff] %vm370_vm3, %v386_v28  ;;  %v390_v32 = vld [vmem:[%s383_s27 + $0x48] sm:$0xff]  ;;  %v391_v33 = vld [vmem:[%s383_s27 + $0x50] sm:$0xff] }
 0x168   : > { %395 = vst.msk [vmem:[%s139_s25 + $0x18] sm:$0xff] %vm370_vm3, %v387_v29  ;;  %396 = vst.msk [vmem:[%s139_s25 + $0x20] sm:$0xff] %vm370_vm3, %v388_v30 }
 0x169   : > { %397 = vst.msk [vmem:[%s139_s25 + $0x28] sm:$0xff] %vm370_vm3, %v389_v31  ;;  %398 = vst.msk [vmem:[%s139_s25 + $0x30] sm:$0xff] %vm370_vm3, %v390_v32 }
 0x16a   : > { %399 = vst.msk [vmem:[%s139_s25 + $0x38] sm:$0xff] %vm370_vm3, %v391_v33 }
 0x16b   : > { %615 = shalt.err (!%p612_p2)
}
 0x16c   : > { %s616_s6 = scalar_lea.hbm %s856_s22, 1024  ;;  %s620_s10 = scalar_lea.hbm %s911_s2, 2048 }
 0x16d   : > { %p617_p9 = scmp.ne.s32.totalorder %s856_s22, %s616_s6  ;;  %p621_p6 = scmp.lt.s32.totalorder %s856_s22, %s911_s2 }
 0x16e   : > { %p622_p11 = scmp.lt.s32.totalorder %s620_s10, %s616_s6 }
 0x16f   : > { %p618_p1 = pnand %p617_p9, %p920_p4 }
 0x170   : > { %p623_p12 = por %p622_p11, %p621_p6 }
 0x171   : > { %p619_p3 = pneg %p618_p1 }
 0x173   : > { %p624_p13 = pnand %p623_p12, %p619_p3 }
 0x175   : > { %627 = shalt.err (!%p624_p13)
}
 0x176   : > { %s678_s18 = smov 128   ;;  %s679_s19 = smov 8  }
 0x177   : > { %510 = dma.vmem_to_hbm [thread:$0]  (%p920_p4), %s858_s26, 1024, %s856_s22, %s401_s0, %s678_s18, %s678_s18, %s679_s19  }
 0x178 PF: > { %s429_s21 = sand.u32 1, %s656_s12   ;;  %p921_p5 = scmp.ne.s32.totalorder %s917_s24, 0 }
 0x179   : > { %p922_p7 = scmp.ge.s32.totalorder %s668_s15, 2  ;;  %s430_s25 = scalar_lea.sflag [#allocation7], %s429_s21 }
 0x17b   : > { %p517_p8 = pnand %p922_p7, %p921_p5 }
 0x17d   : > { %p518_p10 = pneg %p517_p8 }
 0x17f   : > { %651 = dma.done.wait (%p518_p10), %s430_s25, 1024  }
 0x180   : > { %653 = vsyncadd (%p518_p10), %s430_s25, 4294966272  ;;  %p19_p0 = scmp.ge.s32.totalorder %s723_s17, 4   ;;  %s923_s12 = smov %s660_s13 }
 0x181   : > { %s924_s13 = smov %s664_s14  ;;  %s925_s14 = smov %s735_s20 }
 0x182   : > { %s926_s15 = smov %s723_s17  ;;  %21 = sbr.rel (!%p19_p0) target bundleno = 10 (0xa), region = 70 }
 0x187   :  { %435 = vsyncpa [#allocation6], 1 }
 0x188   :  { %437 = vsyncpa [#allocation6 + $0x1], 1 }
 0x189   :  { %438 = vsyncpa [#allocation7], 1 }
 0x18a   :  { %440 = vsyncpa [#allocation7 + $0x1], 1 }

</bundles_post_ra>
